<compile_context>
chip_gen: v7x
topology: tpu7x:2x2x1
jax: 0.10.0
libtpu: 0.0.40
codegen_flags: <defaults>
</compile_context>

<pallas_src>
import functools

import jax
import jax.numpy as jnp
from jax.experimental import pallas as pl
from jax.experimental.pallas import tpu as pltpu

_LN_EPS = 1e-5


# ---------------------------------------------------------------------------
# helpers
# ---------------------------------------------------------------------------
def _round_up(x, m):
    return ((x + m - 1) // m) * m


def _row_align(itemsize):
    # Native sublane packing: f32 -> 8 rows/vreg, bf16 -> 16, int8/fp8 -> 32.
    return {4: 8, 2: 16, 1: 32}.get(itemsize, 8)


def _vmem_capacity_bytes():
    try:
        cap = pltpu.get_tpu_info().vmem_capacity_bytes
        if cap:
            return int(cap)
    except Exception:
        pass
    return 64 << 20  # conservative: v7x per-TensorCore VMEM


def _fused_footprint(tm, tn, Din, x_bytes, out_bytes, mxu_bytes):
    # Double-buffered inputs/outputs + single-buffered y scratch.
    dbuf = (tm * Din * x_bytes      # x tile
            + Din * tn * mxu_bytes  # W tile
            + tm * tn * out_bytes   # out tile
            + tn * 4                # bias tile
            + 2 * Din * 4)          # gamma + beta
    return 2 * dbuf + tm * Din * mxu_bytes


def _select_tiles(R, Din, Dout, x_bytes, out_bytes, mxu_bytes, budget):
    """Pick (tm, tn). Prefer tn = Dout (LN / W never revisited), else the
    largest lane-dense multiple of 128; tm as large as VMEM allows."""
    align = _row_align(x_bytes)
    tn_cands = ([Dout] if Dout <= 4096 else []) + [1024, 512, 256, 128]
    # NOTE: on v7x (2 TCs) the row ("parallel") axis naturally has >= 2 blocks
    # for realistic batch*seq; for tiny inputs one block is fine.
    for tm_cand in (256, 128, 64, 32):
        tm = min(_round_up(tm_cand, align), _round_up(R, align))
        for tn in tn_cands:
            if tn != Dout and (tn % 128 != 0 or tn >= Dout):
                continue
            if _fused_footprint(tm, tn, Din, x_bytes, out_bytes, mxu_bytes) <= budget:
                return tm, tn
    return min(_round_up(R, align), 32), min(Dout, 128)


def _vmem_limit(footprint_bytes, cap):
    limit = int(footprint_bytes * 1.3) + (2 << 20)
    limit = max(limit, 32 << 20)
    return min(limit, int(cap * 0.8))


# ---------------------------------------------------------------------------
# Fused PreNorm(Linear): LayerNorm(x) @ W + b in one kernel
# ---------------------------------------------------------------------------
def _prenorm_linear_kernel(x_ref, g_ref, b_ref, w_ref, bias_ref, o_ref, y_ref,
                           *, eps):
    # LayerNorm once per row block (j == 0), cached in VMEM scratch in the MXU
    # dtype; reused for all output-column tiles of this row block.
    @pl.when(pl.program_id(1) == 0)
    def _():
        x = x_ref[...].astype(jnp.float32)                 # (tm, Din)
        mean = jnp.mean(x, axis=-1, keepdims=True)
        centered = x - mean
        var = jnp.mean(centered * centered, axis=-1, keepdims=True)
        y = centered * jax.lax.rsqrt(var + eps)
        y_ref[...] = (y * g_ref[...] + b_ref[...]).astype(y_ref.dtype)

    acc = jnp.dot(y_ref[...], w_ref[...], preferred_element_type=jnp.float32)
    o_ref[...] = (acc + bias_ref[...]).astype(o_ref.dtype)


def prenorm_linear_pallas(x2d, gamma, beta, w, bias, *, eps=_LN_EPS,
                          mxu_dtype=jnp.bfloat16):
    """Fused LayerNorm(x2d) @ w + bias.  x2d: (R, Din), w: (Din, Dout)."""
    R, Din = x2d.shape
    Dout = w.shape[1]
    out_dtype = x2d.dtype
    x_bytes = x2d.dtype.itemsize
    out_bytes = jnp.dtype(out_dtype).itemsize
    mxu_bytes = jnp.dtype(mxu_dtype).itemsize

    cap = _vmem_capacity_bytes()
    tm, tn = _select_tiles(R, Din, Dout, x_bytes, out_bytes, mxu_bytes,
                           budget=int(cap * 0.45))
    grid = (pl.cdiv(R, tm), pl.cdiv(Dout, tn))
    n_row_blocks = grid[0]

    # Pre-cast weight once (halves W HBM traffic vs f32 + removes per-step
    # in-kernel casts); LN params / bias stay f32 for LN-math / accumulate.
    w_m = w.astype(mxu_dtype)
    g2 = gamma.astype(jnp.float32).reshape(1, Din)
    b2 = beta.astype(jnp.float32).reshape(1, Din)
    bias2 = bias.astype(jnp.float32).reshape(1, Dout)

    cost = pl.CostEstimate(
        flops=2 * R * Din * Dout + 8 * R * Din,
        transcendentals=R,                                   # rsqrt once per row
        bytes_accessed=(R * Din * x_bytes
                        + n_row_blocks * Din * Dout * mxu_bytes  # W per row block
                        + R * Dout * out_bytes
                        + (2 * Din + Dout) * 4),
    )

    footprint = _fused_footprint(tm, tn, Din, x_bytes, out_bytes, mxu_bytes)
    kernel = functools.partial(_prenorm_linear_kernel, eps=eps)
    return pl.pallas_call(
        kernel,
        out_shape=jax.ShapeDtypeStruct((R, Dout), out_dtype),
        grid_spec=pltpu.PrefetchScalarGridSpec(
            num_scalar_prefetch=0,
            grid=grid,
            in_specs=[
                pl.BlockSpec((tm, Din), lambda i, j: (i, 0)),   # x row tile
                pl.BlockSpec((1, Din), lambda i, j: (0, 0)),    # gamma
                pl.BlockSpec((1, Din), lambda i, j: (0, 0)),    # beta
                pl.BlockSpec((Din, tn), lambda i, j: (0, j)),   # W column tile
                pl.BlockSpec((1, tn), lambda i, j: (0, j)),     # bias tile
            ],
            out_specs=pl.BlockSpec((tm, tn), lambda i, j: (i, j)),
            scratch_shapes=[pltpu.VMEM((tm, Din), mxu_dtype)],  # cached LN(x)
        ),
        compiler_params=pltpu.CompilerParams(
            dimension_semantics=("parallel", "arbitrary"),
            vmem_limit_bytes=_vmem_limit(footprint, cap)),
        cost_estimate=cost,
    )(x2d, g2, b2, w_m, bias2)


# ---------------------------------------------------------------------------
# Standalone LayerNorm kernel (used when `fn` is an arbitrary callable)
# ---------------------------------------------------------------------------
def _layernorm_kernel(x_ref, g_ref, b_ref, o_ref, *, eps):
    x = x_ref[...].astype(jnp.float32)
    mean = jnp.mean(x, axis=-1, keepdims=True)
    centered = x - mean
    var = jnp.mean(centered * centered, axis=-1, keepdims=True)
    y = centered * jax.lax.rsqrt(var + eps)
    o_ref[...] = (y * g_ref[...] + b_ref[...]).astype(o_ref.dtype)


def layernorm_pallas(x2d, gamma, beta, *, eps=_LN_EPS):
    R, D = x2d.shape
    align = _row_align(x2d.dtype.itemsize)
    tm = min(_round_up(512, align), _round_up(R, align))
    grid = (pl.cdiv(R, tm),)
    g2 = gamma.astype(jnp.float32).reshape(1, D)
    b2 = beta.astype(jnp.float32).reshape(1, D)
    kernel = functools.partial(_layernorm_kernel, eps=eps)
    return pl.pallas_call(
        kernel,
        out_shape=jax.ShapeDtypeStruct((R, D), x2d.dtype),
        grid_spec=pltpu.PrefetchScalarGridSpec(
            num_scalar_prefetch=0,
            grid=grid,
            in_specs=[
                pl.BlockSpec((tm, D), lambda i: (i, 0)),
                pl.BlockSpec((1, D), lambda i: (0, 0)),
                pl.BlockSpec((1, D), lambda i: (0, 0)),
            ],
            out_specs=pl.BlockSpec((tm, D), lambda i: (i, 0)),
        ),
        compiler_params=pltpu.CompilerParams(
            dimension_semantics=("parallel",)),
    )(x2d, g2, b2)


# ---------------------------------------------------------------------------
# Standalone tiled Linear kernel (fallback path for LinearPallas used alone)
# ---------------------------------------------------------------------------
def _linear_kernel(x_ref, w_ref, b_ref, o_ref, *, mxu_dtype):
    acc = jnp.dot(x_ref[...].astype(mxu_dtype), w_ref[...],
                  preferred_element_type=jnp.float32)
    o_ref[...] = (acc + b_ref[...]).astype(o_ref.dtype)


def linear_pallas(x2d, w, b, *, mxu_dtype=jnp.bfloat16):
    R, Din = x2d.shape
    Dout = w.shape[1]
    out_dtype = x2d.dtype
    x_bytes = x2d.dtype.itemsize
    out_bytes = jnp.dtype(out_dtype).itemsize
    mxu_bytes = jnp.dtype(mxu_dtype).itemsize
    cap = _vmem_capacity_bytes()
    tm, tn = _select_tiles(R, Din, Dout, x_bytes, out_bytes, mxu_bytes,
                           budget=int(cap * 0.45))
    grid = (pl.cdiv(R, tm), pl.cdiv(Dout, tn))
    w_m = w.astype(mxu_dtype)
    b2 = b.astype(jnp.float32).reshape(1, Dout)
    cost = pl.CostEstimate(
        flops=2 * R * Din * Dout, transcendentals=0,
        bytes_accessed=(R * Din * x_bytes + grid[0] * Din * Dout * mxu_bytes
                        + R * Dout * out_bytes + Dout * 4))
    footprint = _fused_footprint(tm, tn, Din, x_bytes, out_bytes, mxu_bytes)
    kernel = functools.partial(_linear_kernel, mxu_dtype=mxu_dtype)
    return pl.pallas_call(
        kernel,
        out_shape=jax.ShapeDtypeStruct((R, Dout), out_dtype),
        grid_spec=pltpu.PrefetchScalarGridSpec(
            num_scalar_prefetch=0,
            grid=grid,
            in_specs=[
                pl.BlockSpec((tm, Din), lambda i, j: (i, 0)),
                pl.BlockSpec((Din, tn), lambda i, j: (0, j)),
                pl.BlockSpec((1, tn), lambda i, j: (0, j)),
            ],
            out_specs=pl.BlockSpec((tm, tn), lambda i, j: (i, j)),
        ),
        compiler_params=pltpu.CompilerParams(
            dimension_semantics=("parallel", "arbitrary"),
            vmem_limit_bytes=_vmem_limit(footprint, cap)),
        cost_estimate=cost,
    )(x2d, w_m, b2)


# ---------------------------------------------------------------------------
# Module wrappers
# ---------------------------------------------------------------------------
class LinearPallas:
    """Linear(Din, Dout) whose application PreNorm can fuse with its LayerNorm."""

    def __init__(self, w, b):
        self.w = w
        self.b = b

    def __call__(self, y):
        B, S, D = y.shape
        out = linear_pallas(y.reshape(B * S, D), self.w, self.b)
        return out.reshape(B, S, -1)


class PreNorm:
    """JAX/Pallas equivalent of the PyTorch PreNorm module: fn(LayerNorm(x))."""

    def __init__(self, dim, fn, eps=_LN_EPS, mxu_dtype=jnp.bfloat16):
        self.dim = dim
        self.fn = fn
        self.eps = eps
        # Set mxu_dtype=jnp.float32 for exact f32 nn.Linear parity (v5e-style).
        self.mxu_dtype = mxu_dtype
        # nn.LayerNorm default init: weight=1, bias=0
        self.gamma = jnp.ones((dim,), jnp.float32)
        self.beta = jnp.zeros((dim,), jnp.float32)

    def __call__(self, x, **kwargs):
        B, S, D = x.shape
        x2d = x.reshape(B * S, D)
        if isinstance(self.fn, LinearPallas) and not kwargs:
            # Fused LN + Linear: the normed tensor never touches HBM.
            out = prenorm_linear_pallas(x2d, self.gamma, self.beta,
                                        self.fn.w, self.fn.b, eps=self.eps,
                                        mxu_dtype=self.mxu_dtype)
            return out.reshape(B, S, -1)
        # Generic fn: Pallas LayerNorm, then apply the opaque callable.
        # TODO(synk): arbitrary `fn` bodies cannot be fused into the kernel.
        normed = layernorm_pallas(x2d, self.gamma, self.beta, eps=self.eps)
        return self.fn(normed.reshape(B, S, D), **kwargs)


# ---------------------------------------------------------------------------
# Demo / correctness check
# ---------------------------------------------------------------------------
if __name__ == "__main__":
    key = jax.random.PRNGKey(0)

    def ref_prenorm_linear(x, gamma, beta, w, b):
        mean = jnp.mean(x, axis=-1, keepdims=True)
        var = jnp.mean((x - mean) ** 2, axis=-1, keepdims=True)
        y = (x - mean) * jax.lax.rsqrt(var + jnp.float32(_LN_EPS))
        y = y * gamma + beta
        out = jnp.einsum("bsd,de->bse", y.astype(jnp.bfloat16),
                         w.astype(jnp.bfloat16),
                         preferred_element_type=jnp.float32) + b
        return y, out

    # --- fused path: PreNorm(dim, Linear(dim, dim)), even shapes ---
    B, S, D = 2, 8, 128
    k_x, k_w, k_b = jax.random.split(key, 3)
    x = jax.random.normal(k_x, (B, S, D), dtype=jnp.float32)
    w = jax.random.normal(k_w, (D, D), dtype=jnp.float32) / jnp.sqrt(jnp.float32(D))
    b = 0.01 * jax.random.normal(k_b, (D,), dtype=jnp.float32)

    prenorm = PreNorm(D, LinearPallas(w, b))
    out = jax.block_until_ready(prenorm(x))
    y_ref, ref = ref_prenorm_linear(x, prenorm.gamma, prenorm.beta, w, b)
    assert out.shape == (B, S, D)
    assert jnp.allclose(out, ref, atol=2e-2, rtol=2e-2), \
        float(jnp.max(jnp.abs(out - ref)))

    # --- fused path, ragged row count (row tile does not divide B*S) ---
    S2 = 9   # ViT-style odd token count (e.g. with cls token)
    x2 = jax.random.normal(jax.random.PRNGKey(1), (B, S2, D), dtype=jnp.float32)
    out2 = jax.block_until_ready(prenorm(x2))
    _, ref2 = ref_prenorm_linear(x2, prenorm.gamma, prenorm.beta, w, b)
    assert out2.shape == (B, S2, D)
    assert jnp.allclose(out2, ref2, atol=2e-2, rtol=2e-2), \
        float(jnp.max(jnp.abs(out2 - ref2)))

    # --- generic-fn path (standalone LayerNorm kernel) ---
    out3 = jax.block_until_ready(PreNorm(D, lambda t: t * 2.0)(x))
    assert jnp.allclose(out3, 2.0 * y_ref, atol=1e-4, rtol=1e-4)

    print("KERNEL_OK")
</pallas_src>

<mosaic_0001>
module attributes {stable_mosaic.version = 11 : i64} {
  func.func @_prenorm_linear_kernel(%arg0: i32, %arg1: i32, %arg2: memref<16x128xf32, #tpu.memory_space<vmem>>, %arg3: memref<1x128xf32, #tpu.memory_space<vmem>>, %arg4: memref<1x128xf32, #tpu.memory_space<vmem>>, %arg5: memref<128x128xbf16, #tpu.memory_space<vmem>>, %arg6: memref<1x128xf32, #tpu.memory_space<vmem>>, %arg7: memref<16x128xf32, #tpu.memory_space<vmem>>, %arg8: memref<16x128xbf16, #tpu.memory_space<vmem>>) attributes {dimension_semantics = [#tpu.dimension_semantics<parallel>, #tpu.dimension_semantics<arbitrary>], iteration_bounds = array<i64: 1, 1>, scalar_prefetch = 0 : i64, scratch_operands = 1 : i64, tpu.core_type = #tpu.core_type<tc>, window_params = [{transform_indices = @transform_0, window_bounds = array<i64: 16, 128>}, {pipeline_mode = #tpu.pipeline_mode<synchronous>, transform_indices = @transform_1, window_bounds = array<i64: 1, 128>}, {pipeline_mode = #tpu.pipeline_mode<synchronous>, transform_indices = @transform_2, window_bounds = array<i64: 1, 128>}, {transform_indices = @transform_3, window_bounds = array<i64: 128, 128>}, {transform_indices = @transform_4, window_bounds = array<i64: 1, 128>}, {transform_indices = @transform_5, window_bounds = array<i64: 16, 128>}]} {
    %c0_i32 = arith.constant 0 : i32
    %0 = arith.cmpi eq, %arg1, %c0_i32 : i32
    %1 = arith.extui %0 : i1 to i32
    %c0_i32_0 = arith.constant 0 : i32
    %2 = arith.cmpi ne, %1, %c0_i32_0 : i32
    scf.if %2 {
      %c0_8 = arith.constant 0 : index
      %c0_9 = arith.constant 0 : index
      %10 = vector.load %arg2[%c0_8, %c0_9] : memref<16x128xf32, #tpu.memory_space<vmem>>, vector<16x128xf32>
      %cst_10 = arith.constant dense<0.000000e+00> : vector<16xf32>
      %11 = vector.multi_reduction <add>, %10, %cst_10 [1] : vector<16x128xf32> to vector<16xf32>
      %12 = vector.shape_cast %11 : vector<16xf32> to vector<16x1xf32>
      %cst_11 = arith.constant 1.280000e+02 : f32
      %13 = vector.broadcast %cst_11 : f32 to vector<16x1xf32>
      %14 = arith.divf %12, %13 : vector<16x1xf32>
      %15 = vector.broadcast %14 : vector<16x1xf32> to vector<16x128xf32>
      %16 = arith.subf %10, %15 : vector<16x128xf32>
      %17 = arith.mulf %16, %16 : vector<16x128xf32>
      %cst_12 = arith.constant dense<0.000000e+00> : vector<16xf32>
      %18 = vector.multi_reduction <add>, %17, %cst_12 [1] : vector<16x128xf32> to vector<16xf32>
      %19 = vector.shape_cast %18 : vector<16xf32> to vector<16x1xf32>
      %cst_13 = arith.constant 1.280000e+02 : f32
      %20 = vector.broadcast %cst_13 : f32 to vector<16x1xf32>
      %21 = arith.divf %19, %20 : vector<16x1xf32>
      %cst_14 = arith.constant 9.99999974E-6 : f32
      %22 = vector.broadcast %cst_14 : f32 to vector<16x1xf32>
      %23 = arith.addf %21, %22 : vector<16x1xf32>
      %24 = math.rsqrt %23 : vector<16x1xf32>
      %25 = vector.broadcast %24 : vector<16x1xf32> to vector<16x128xf32>
      %26 = arith.mulf %16, %25 : vector<16x128xf32>
      %c0_15 = arith.constant 0 : index
      %c0_16 = arith.constant 0 : index
      %27 = vector.load %arg3[%c0_15, %c0_16] : memref<1x128xf32, #tpu.memory_space<vmem>>, vector<1x128xf32>
      %28 = vector.broadcast %27 : vector<1x128xf32> to vector<16x128xf32>
      %29 = arith.mulf %26, %28 : vector<16x128xf32>
      %c0_17 = arith.constant 0 : index
      %c0_18 = arith.constant 0 : index
      %30 = vector.load %arg4[%c0_17, %c0_18] : memref<1x128xf32, #tpu.memory_space<vmem>>, vector<1x128xf32>
      %31 = vector.broadcast %30 : vector<1x128xf32> to vector<16x128xf32>
      %32 = arith.addf %29, %31 : vector<16x128xf32>
      %33 = arith.truncf %32 : vector<16x128xf32> to vector<16x128xbf16>
      %c0_19 = arith.constant 0 : index
      %c0_20 = arith.constant 0 : index
      %34 = vector.load %arg8[%c0_19, %c0_20] : memref<16x128xbf16, #tpu.memory_space<vmem>>, vector<16x128xbf16>
      tpu.vector_store %arg8[%c0_19, %c0_20], %33 {strides = array<i32>} : memref<16x128xbf16, #tpu.memory_space<vmem>>, vector<16x128xbf16>,
    } else {
    }
    %c0 = arith.constant 0 : index
    %c0_1 = arith.constant 0 : index
    %3 = vector.load %arg8[%c0, %c0_1] : memref<16x128xbf16, #tpu.memory_space<vmem>>, vector<16x128xbf16>
    %c0_2 = arith.constant 0 : index
    %c0_3 = arith.constant 0 : index
    %4 = vector.load %arg5[%c0_2, %c0_3] : memref<128x128xbf16, #tpu.memory_space<vmem>>, vector<128x128xbf16>
    %cst = arith.constant dense<0.000000e+00> : vector<16x128xf32>
    %5 = tpu.matmul %3, %4, %cst {dimension_numbers = #tpu.dot_dimension_numbers<[1], [0], [0], [1], [0, 0, 1, 1], [], []>} : vector<16x128xbf16>, vector<128x128xbf16>, vector<16x128xf32> -> vector<16x128xf32>
    %c0_4 = arith.constant 0 : index
    %c0_5 = arith.constant 0 : index
    %6 = vector.load %arg6[%c0_4, %c0_5] : memref<1x128xf32, #tpu.memory_space<vmem>>, vector<1x128xf32>
    %7 = vector.broadcast %6 : vector<1x128xf32> to vector<16x128xf32>
    %8 = arith.addf %5, %7 : vector<16x128xf32>
    %c0_6 = arith.constant 0 : index
    %c0_7 = arith.constant 0 : index
    %9 = vector.load %arg7[%c0_6, %c0_7] : memref<16x128xf32, #tpu.memory_space<vmem>>, vector<16x128xf32>
    tpu.vector_store %arg7[%c0_6, %c0_7], %8 {strides = array<i32>} : memref<16x128xf32, #tpu.memory_space<vmem>>, vector<16x128xf32>,
    return
  }
  func.func @transform_0(%arg0: i32, %arg1: i32) -> (i32, i32) {
    %c0_i32 = arith.constant 0 : i32
    %c0_i32_0 = arith.constant 0 : i32
    return %arg0, %c0_i32 : i32, i32
  }
  func.func @transform_1(%arg0: i32, %arg1: i32) -> (i32, i32) {
    %c0_i32 = arith.constant 0 : i32
    %c0_i32_0 = arith.constant 0 : i32
    %c0_i32_1 = arith.constant 0 : i32
    return %c0_i32, %c0_i32_0 : i32, i32
  }
  func.func @transform_2(%arg0: i32, %arg1: i32) -> (i32, i32) {
    %c0_i32 = arith.constant 0 : i32
    %c0_i32_0 = arith.constant 0 : i32
    %c0_i32_1 = arith.constant 0 : i32
    return %c0_i32, %c0_i32_0 : i32, i32
  }
  func.func @transform_3(%arg0: i32, %arg1: i32) -> (i32, i32) {
    %c0_i32 = arith.constant 0 : i32
    %c0_i32_0 = arith.constant 0 : i32
    return %c0_i32, %arg1 : i32, i32
  }
  func.func @transform_4(%arg0: i32, %arg1: i32) -> (i32, i32) {
    %c0_i32 = arith.constant 0 : i32
    %c0_i32_0 = arith.constant 0 : i32
    return %c0_i32, %arg1 : i32, i32
  }
  func.func @transform_5(%arg0: i32, %arg1: i32) -> (i32, i32) {
    %c0_i32 = arith.constant 0 : i32
    return %arg0, %arg1 : i32, i32
  }
}

</mosaic_0001>

<bundles_post_ra>
// kernel: tpu_custom_call.1
= control target key start
LH: loop header
LB: loop body
LE: loop exit
PB: predicated region body
PF: predicated region fallthrough
CT: control target
= control target key end

     0   :  { %10 = vsyncpa [#allocation4], 0  ;;  %s455_s0 = inlined_call_operand.hbm [shape: f32[16,128], index: 0, kind: input, shape index: {}]   ;;  %s456_s1 = inlined_call_operand.vmem [shape: f32[1,128], index: 1, kind: input, shape index: {}]   ;;  %s457_s2 = inlined_call_operand.vmem [shape: f32[1,128], index: 2, kind: input, shape index: {}]   ;;  %s458_s3 = inlined_call_operand.hbm [shape: bf16[128,128], index: 3, kind: input, shape index: {}]   ;;  %s459_s4 = inlined_call_operand.vmem [shape: f32[1,128], index: 4, kind: input, shape index: {}]   ;;  %s460_s5 = inlined_call_operand.hbm [shape: f32[16,128], index: 5, kind: output, shape index: {}]  }
   0x1   :  { %11 = vsyncpa [#allocation7], 0 }
   0x2   :  { %12 = vsyncpa [#allocation5], 0  ;;  %s365_s18 = smov [#allocation3]   ;;  %s293_s22 = scalar_lea.hbm %s455_s0, 256 }
   0x3   :  { %s18_s19 = sshll.u32 %s365_s18, 4  ;;  %p294_p0 = scmp.ne.s32.totalorder %s455_s0, %s293_s22  ;;  %s19_s19 = int_to_ptr.vmem [resolvable:$true] %s18_s19 }
   0x4   :  { %p297_p1 = scmp.lt.u32.totalorder %s293_s22, %s455_s0 }
   0x6   :  { %p299_p2 = pnand %p297_p1, %p294_p0 }
   0x8   :  { %302 = shalt.err (!%p299_p2)
}
   0x9   :  { %s303_s27 = scalar_lea.vmem %s19_s19, 256  ;;  %p308_p4 = scmp.lt.s32.totalorder %s19_s19, %s19_s19 }
   0xa   :  { %p304_p3 = scmp.ne.s32.totalorder %s19_s19, %s303_s27  ;;  %p309_p5 = scmp.lt.s32.totalorder %s303_s27, %s303_s27 }
   0xc   :  { %p310_p6 = por %p309_p5, %p308_p4 }
   0xe   :  { %p311_p7 = pnand %p310_p6, %p304_p3 }
  0x10   :  { %314 = shalt.err (!%p311_p7)
}
  0x11   :  { %s366_s28 = smov 128   ;;  %s367_s29 = smov 8  }
  0x12   :  { %24 = dma.hbm_to_vmem [thread:$0]  %s455_s0, 256, %s19_s19, [#allocation4], %s366_s28, %s366_s28, %s367_s29  }
  0x13   :  { %s368_s7 = smov [#allocation6]   ;;  %s315_s11 = scalar_lea.hbm %s458_s3, 1024 }
  0x14   :  { %s34_s8 = sshll.u32 %s368_s7, 4  ;;  %p316_p8 = scmp.ne.s32.totalorder %s458_s3, %s315_s11  ;;  %s35_s8 = int_to_ptr.vmem [resolvable:$true] %s34_s8 }
  0x15   :  { %p319_p9 = scmp.lt.u32.totalorder %s315_s11, %s458_s3 }
  0x17   :  { %p321_p10 = pnand %p319_p9, %p316_p8 }
  0x19   :  { %324 = shalt.err (!%p321_p10)
}
  0x1a   :  { %s325_s16 = scalar_lea.vmem %s35_s8, 1024  ;;  %p330_p12 = scmp.lt.s32.totalorder %s35_s8, %s35_s8 }
  0x1b   :  { %p326_p11 = scmp.ne.s32.totalorder %s35_s8, %s325_s16  ;;  %p331_p13 = scmp.lt.s32.totalorder %s325_s16, %s325_s16 }
  0x1d   :  { %p332_p0 = por %p331_p13, %p330_p12 }
  0x1f   :  { %p333_p1 = pnand %p332_p0, %p326_p11 }
  0x21   :  { %336 = shalt.err (!%p333_p1)
}
  0x22   :  { %s369_s0 = smov 64   ;;  %s370_s17 = smov 4  }
  0x23   :  { %40 = dma.hbm_to_vmem [thread:$0]  %s458_s3, 1024, %s35_s8, [#allocation7], %s369_s0, %s369_s0, %s370_s17  }
  0x24   :  { %359 = dma.done.wait [#allocation4], 256  }
  0x25   :  { %360 = vsyncadd [#allocation4], 4294967040 }
  0x26   :  { %361 = dma.done.wait [#allocation7], 1024  }
  0x27   :  { %362 = vsyncadd [#allocation7], 4294966272  ;;  %v54_v0 = vld [vmem:[#allocation3] sm:$0xff]  ;;  %v55_v1 = vld [vmem:[#allocation3 + $0x8] sm:$0xff]  ;;  %v371_v3 = vmov 0.0   ;;  %vm372_vm0 = vmmov 0  }
  0x28   :  { %56 = vadd.xlane.f32.xlu0 %v54_v0  ;;  %v281_v2 = vld [vmem:[#allocation6] sm:$0xff]   ;;  %252 = vmatprep.subr.bf16.mxu0 %v371_v3  ;;  %v282_v12 = vld [vmem:[#allocation6 + $0x8] sm:$0xff]   ;;  %v283_v13 = vld [vmem:[#allocation6 + $0x10] sm:$0xff]   ;;  %s373_s25 = smov [#allocation8]  }
  0x29   :  { %253 = vmatpush3.bf16.msra.mxu0 %v281_v2  ;;  %v284_v14 = vld [vmem:[#allocation6 + $0x18] sm:$0xff]   ;;  %v285_v15 = vld [vmem:[#allocation6 + $0x20] sm:$0xff]   ;;  %268 = vmatprep.mubr.msk.bf16.mxu0 %vm372_vm0, %v371_v3  ;;  %v286_v16 = vld [vmem:[#allocation6 + $0x28] sm:$0xff]   ;;  %s219_s26 = sshll.u32 %s373_s25, 4  ;;  %s220_s26 = int_to_ptr.vmem [resolvable:$true] %s219_s26 }
  0x2a   :  { %254 = vmatprep.subr.bf16.mxu0 %v371_v3  ;;  %v287_v17 = vld [vmem:[#allocation6 + $0x30] sm:$0xff]   ;;  %v288_v18 = vld [vmem:[#allocation6 + $0x38] sm:$0xff]   ;;  %p342_p3 = scmp.lt.s32.totalorder %s220_s26, %s220_s26 }
  0x2b   :  { %v232_v27 = vld [vmem:[%s456_s1] ss:$0 sm:$0xff]  ;;  %s337_s1 = scalar_lea.vmem %s220_s26, 256 }
  0x2c   :  { %58 = vadd.xlane.f32.xlu0 %v55_v1  ;;  %v233_v31 = vld [vmem:[%s457_s2] ss:$0 sm:$0xff]  ;;  %p338_p2 = scmp.ne.s32.totalorder %s220_s26, %s337_s1  ;;  %p343_p4 = scmp.lt.s32.totalorder %s337_s1, %s337_s1 }
  0x2d   :  { %255 = vmatpush3.bf16.msra.mxu0 %v282_v12  ;;  %v234_v36 = vld [vmem:[%s459_s4] ss:$0 sm:$0xff] }
  0x2e   :  { %256 = vmatprep.subr.bf16.mxu0 %v371_v3  ;;  %p344_p5 = por %p343_p4, %p342_p3 }
  0x30   :  { %p345_p6 = pnand %p344_p5, %p338_p2 }
  0x31   :  { %257 = vmatpush3.bf16.msra.mxu0 %v283_v13 }
  0x32   :  { %258 = vmatprep.subr.bf16.mxu0 %v371_v3 }
  0x35   :  { %259 = vmatpush3.bf16.msra.mxu0 %v284_v14 }
  0x36   :  { %260 = vmatprep.subr.bf16.mxu0 %v371_v3 }
  0x39   :  { %261 = vmatpush3.bf16.msra.mxu0 %v285_v15 }
  0x3a   :  { %262 = vmatprep.subr.bf16.mxu0 %v371_v3 }
  0x3d   :  { %263 = vmatpush3.bf16.msra.mxu0 %v286_v16 }
  0x3e   :  { %264 = vmatprep.subr.bf16.mxu0 %v371_v3 }
  0x41   :  { %265 = vmatpush3.bf16.msra.mxu0 %v287_v17 }
  0x42   :  { %266 = vmatprep.subr.bf16.mxu0 %v371_v3 }
  0x45   :  { %267 = vmatpush3.bf16.msra.mxu0 %v288_v18 }
  0xb5   :  { %v57_v4 = vpop.xlane.xlu0 %56 }
  0xb6   :  { %v61_v5 = vmul.f32 0.0078125, %v57_v4 }
  0xb8   :  { %v63_v6 = vsub.f32 %v54_v0, %v61_v5 }
  0xb9   :  { %v59_v7 = vpop.xlane.xlu0 %58 }
  0xba   :  { %v62_v8 = vmul.f32 0.0078125, %v59_v7  ;;  %v65_v9 = vmul.f32 %v63_v6, %v63_v6 }
  0xbc   :  { %v64_v10 = vsub.f32 %v55_v1, %v62_v8  ;;  %67 = vadd.xlane.f32.xlu1 %v65_v9 }
  0xbe   :  { %v66_v11 = vmul.f32 %v64_v10, %v64_v10 }
  0xc0   :  { %69 = vadd.xlane.f32.xlu1 %v66_v11 }
 0x149   :  { %v68_v19 = vpop.xlane.xlu1 %67 }
 0x14a   :  { %v71_v20 = vmul.f32 0.0078125, %v68_v19 }
 0x14c   :  { %v73_v21 = vadd.f32 1e-05, %v71_v20 }
 0x14d   :  { %v70_v22 = vpop.xlane.xlu1 %69 }
 0x14e   :  { %289 = vrsqrt.f32 %v73_v21  ;;  %v72_v23 = vmul.f32 0.0078125, %v70_v22 }
 0x150   :  { %v74_v24 = vadd.f32 1e-05, %v72_v23 }
 0x152   :  { %291 = vrsqrt.f32 %v74_v24 }
 0x158   :  { %v290_v25 = vpop.eup %289 }
 0x159   :  { %v77_v26 = vmul.f32 %v290_v25, %v63_v6 }
 0x15b   :  { %v86_v30 = vmul.f32 %v232_v27, %v77_v26 }
 0x15c   :  { %v292_v28 = vpop.eup %291 }
 0x15d   :  { %v78_v29 = vmul.f32 %v292_v28, %v64_v10  ;;  %v95_v33 = vadd.f32 %v233_v31, %v86_v30 }
 0x15f   :  { %v87_v32 = vmul.f32 %v232_v27, %v78_v29 }
 0x161   :  { %v96_v34 = vadd.f32 %v233_v31, %v87_v32 }
 0x163   :  { %v97_v35 = vpack.c.bf16 %v96_v34, %v95_v33 }
 0x165   :  { %269 = vmatmul.mubr.bf16.vlgmr.msra.gmra.mrb[0].mxu0 %v97_v35 }
 0x238   :  { %v205_v37 = vpop.f32.mrb[0].mxu0 }
 0x239   :  { %v206_v38 = vadd.f32 %v234_v36, %v205_v37  ;;  %v270_v39 = vpop.f32.mrb[1].mxu0 }
 0x23a   :  { %v208_v40 = vpop.f32.mrb[2].mxu0 }
 0x23b   :  { %212 = vst [vmem:[#allocation8] sm:$0xff] %v206_v38  ;;  %v209_v41 = vadd.f32 %v234_v36, %v208_v40  ;;  %v271_v42 = vpop.f32.mrb[3].mxu0 }
 0x23d   :  { %213 = vst [vmem:[#allocation8 + $0x8] sm:$0xff] %v209_v41 }
 0x23e   :  { %348 = shalt.err (!%p345_p6)
}
 0x23f   :  { %s349_s27 = scalar_lea.hbm %s460_s5, 256 }
 0x240   :  { %p350_p7 = scmp.ne.s32.totalorder %s460_s5, %s349_s27  ;;  %p353_p8 = scmp.lt.u32.totalorder %s349_s27, %s460_s5 }
 0x242   :  { %p355_p9 = pnand %p353_p8, %p350_p7 }
 0x244   :  { %358 = shalt.err (!%p355_p9)
}
 0x245   :  { %225 = dma.vmem_to_hbm [thread:$0]  %s220_s26, 256, %s460_s5, [#allocation5], %s366_s28, %s366_s28, %s367_s29  }
 0x246   :  { %363 = dma.done.wait [#allocation5], 256  }
 0x247   :  { %364 = vsyncadd [#allocation5], 4294967040 }
 0x248   :  { %229 = vsyncpa [#allocation4], 1 }
 0x249   :  { %230 = vsyncpa [#allocation7], 1 }
 0x24a   :  { %231 = vsyncpa [#allocation5], 1 }

</bundles_post_ra>
